<compile_context>
chip_gen: v5e
topology: v5e:2x2
jax: 0.10.0
libtpu: 0.0.40
codegen_flags: <defaults>
</compile_context>

<pallas_src>
import functools

import jax
import jax.numpy as jnp
from jax.experimental import pallas as pl
from jax.experimental.pallas import tpu as pltpu


# ------------------------------ VMEM budgeting ------------------------------
def _vmem_caps():
    """(tile byte budget, vmem_limit_bytes) derived from the actual chip."""
    try:
        cap = int(pltpu.get_tpu_info().vmem_capacity_bytes)
    except Exception:  # interpret mode / older API — be conservative (v7x size)
        cap = 64 * 1024 * 1024
    budget = int(cap * 0.75)   # what we let the per-step blocks consume
    limit = int(cap * 0.85)    # scoped-VMEM limit handed to Mosaic
    return budget, limit


def _pick_hw_tile(hw, t_max):
    """Pick a spatial tile (multiple of 128, <= t_max) and the padded HW it divides."""
    best = 0
    if hw % 128 == 0:
        for t in range(min(t_max, hw), 127, -128):
            if hw % t == 0:
                best = t
                break
    if best >= max(128, t_max // 4):          # good divisor found -> no padding
        return best, hw
    t = min(t_max, ((hw + 127) // 128) * 128)  # otherwise pad HW up to a tile multiple
    hw_pad = ((hw + t - 1) // t) * t
    return t, hw_pad


# --------------------------- fused single-pass kernel ---------------------------
def _scse_fused_kernel(x_ref, w1_ref, b1_ref, w2_ref, b2_ref, ws_ref, bs_ref,
                       o_ref, *, inv_hw):
    x = x_ref[0]                                                     # (C, HW), native dtype
    # channel squeeze: avg-pool in f32
    mean = jnp.sum(x, axis=1, keepdims=True, dtype=jnp.float32) * inv_hw   # (C, 1)
    # tiny excitation MLP (f32)
    h = jnp.dot(w1_ref[...], mean, preferred_element_type=jnp.float32) + b1_ref[...]
    h = jnp.maximum(h, 0.0)                                          # (Cr, 1)
    cse = jax.nn.sigmoid(
        jnp.dot(w2_ref[...], h, preferred_element_type=jnp.float32) + b2_ref[...])  # (C, 1)
    # spatial squeeze: per-position channel reduction on VPU/XLU (native dtype product)
    ws = ws_ref[...].astype(x.dtype)                                 # (C, 1)
    s = jnp.sum(x * ws, axis=0, keepdims=True, dtype=jnp.float32)    # (1, HW)
    sse = jax.nn.sigmoid(s + bs_ref[0])                              # (1, HW)
    # fused gates: one add + one multiply per element, in x's dtype
    gate = (cse + sse).astype(x.dtype)                               # (C, HW)
    o_ref[0] = x * gate


# --------------------------- fallback pass 1: pooling ---------------------------
def _pool_sum_kernel(x_ref, sum_ref, acc_ref):
    t = pl.program_id(1)

    @pl.when(t == 0)
    def _init():
        acc_ref[...] = jnp.zeros_like(acc_ref)

    acc_ref[...] += jnp.sum(x_ref[0], axis=1, keepdims=True, dtype=jnp.float32)

    @pl.when(t == pl.num_programs(1) - 1)
    def _finalize():
        sum_ref[0] = acc_ref[...]


# --------------------------- fallback pass 2: apply gates ---------------------------
def _scse_apply_kernel(gate_ref, x_ref, ws_ref, bs_ref, o_ref):
    x = x_ref[0]                                                     # (C, THW), native dtype
    ws = ws_ref[...].astype(x.dtype)                                 # (C, 1)
    s = jnp.sum(x * ws, axis=0, keepdims=True, dtype=jnp.float32)    # (1, THW)
    sse = jax.nn.sigmoid(s + bs_ref[0])
    gate = (gate_ref[0] + sse).astype(x.dtype)                       # (C, THW)
    o_ref[0] = x * gate


# --------------------------------- wrapper ---------------------------------
def scse_pallas(x_nchw, params, *, vmem_budget=None):
    """x_nchw: (N, C, H, W). Returns (N, C, H, W) with the same dtype."""
    w1, b1, w2, b2, ws, bs = params          # PyTorch conv-shaped params (see make_params)
    N, C, H, W = x_nchw.shape
    HW = H * W
    Cr = w1.shape[0]

    budget, vmem_limit = _vmem_caps()
    if vmem_budget is not None:              # test hook: force the tiled fallback
        budget = int(vmem_budget)

    # NCHW -> (N, C, HW): pure reshape, no transpose, no extra HBM traffic.
    x = x_nchw.reshape(N, C, HW)
    itemsize = x.dtype.itemsize

    w1_k = w1.astype(jnp.float32)                  # (Cr, C)
    b1_k = b1.reshape(Cr, 1).astype(jnp.float32)   # (Cr, 1)
    w2_k = w2.astype(jnp.float32)                  # (C, Cr)
    b2_k = b2.reshape(C, 1).astype(jnp.float32)    # (C, 1)
    ws_k = ws.reshape(C, 1).astype(jnp.float32)    # conv1x1 (1, C) weight as a column
    bs_k = bs.reshape(1).astype(jnp.float32)       # scalar bias -> SMEM

    # ------------- preferred path: one fused pass per image (2x|x| HBM traffic) -------------
    resident_bytes = (Cr * C + C * Cr + Cr + C + C) * 4
    fused_bytes = 4 * C * HW * itemsize + resident_bytes   # 2x in-block + 2x out-block + weights
    if fused_bytes <= budget:
        out = pl.pallas_call(
            functools.partial(_scse_fused_kernel, inv_hw=1.0 / float(HW)),
            out_shape=jax.ShapeDtypeStruct((N, C, HW), x.dtype),
            grid_spec=pltpu.PrefetchScalarGridSpec(
                num_scalar_prefetch=0,
                grid=(N,),
                in_specs=[
                    pl.BlockSpec((1, C, HW), lambda n: (n, 0, 0)),        # whole image
                    pl.BlockSpec((Cr, C), lambda n: (0, 0)),              # w1 (resident)
                    pl.BlockSpec((Cr, 1), lambda n: (0, 0)),              # b1
                    pl.BlockSpec((C, Cr), lambda n: (0, 0)),              # w2
                    pl.BlockSpec((C, 1), lambda n: (0, 0)),               # b2
                    pl.BlockSpec((C, 1), lambda n: (0, 0)),               # ws
                    pl.BlockSpec(memory_space=pltpu.MemorySpace.SMEM),    # bs scalar
                ],
                out_specs=pl.BlockSpec((1, C, HW), lambda n: (n, 0, 0)),
            ),
            compiler_params=pltpu.CompilerParams(
                dimension_semantics=("parallel",),
                vmem_limit_bytes=vmem_limit,
            ),
        )(x, w1_k, b1_k, w2_k, b2_k, ws_k, bs_k)
        return out.reshape(N, C, H, W)

    # ------------- fallback: tiled 2-pass (large images) -------------
    # Pass-2 footprint per step ~ 4 * C * thw * itemsize (2x in + 2x out blocks).
    max_t2 = max(128, ((budget // (4 * C * itemsize)) // 128) * 128)
    thw2, hw_pad = _pick_hw_tile(HW, max_t2)
    if hw_pad != HW:
        x = jnp.pad(x, ((0, 0), (0, 0), (0, hw_pad - HW)))   # zeros: mean & output unaffected
    n_t2 = hw_pad // thw2
    # Pass 1 has no output block per step -> it can take a 2x larger tile when it divides.
    thw1 = 2 * thw2 if (n_t2 % 2 == 0 and n_t2 >= 2) else thw2
    n_t1 = hw_pad // thw1

    sums = pl.pallas_call(
        _pool_sum_kernel,
        out_shape=jax.ShapeDtypeStruct((N, C, 1), jnp.float32),
        grid_spec=pltpu.PrefetchScalarGridSpec(
            num_scalar_prefetch=0,
            grid=(N, n_t1),
            in_specs=[pl.BlockSpec((1, C, thw1), lambda n, t: (n, 0, t))],
            out_specs=pl.BlockSpec((1, C, 1), lambda n, t: (n, 0, 0)),
            scratch_shapes=[pltpu.VMEM((C, 1), jnp.float32)],
        ),
        compiler_params=pltpu.CompilerParams(
            dimension_semantics=("parallel", "arbitrary"),
            vmem_limit_bytes=vmem_limit,
        ),
    )(x)

    # Tiny cSE MLP in plain JAX: removes four resident weight buffers and the
    # lane-width-1 matmuls from the hot kernels (frees VMEM for bigger x tiles).
    mean = sums.reshape(N, C) * (1.0 / float(HW))
    h = jax.nn.relu(mean @ w1_k.T + b1_k.reshape(1, Cr))
    cse = jax.nn.sigmoid(h @ w2_k.T + b2_k.reshape(1, C)).reshape(N, C, 1)

    # TODO(synk): if the caller can donate x, add input_output_aliases={1: 0} here
    # to avoid allocating a second full-size HBM buffer.
    out = pl.pallas_call(
        _scse_apply_kernel,
        out_shape=jax.ShapeDtypeStruct((N, C, hw_pad), x.dtype),
        grid_spec=pltpu.PrefetchScalarGridSpec(
            num_scalar_prefetch=0,
            grid=(N, n_t2),
            in_specs=[
                pl.BlockSpec((1, C, 1), lambda n, t: (n, 0, 0)),      # cSE gate (resident per image)
                pl.BlockSpec((1, C, thw2), lambda n, t: (n, 0, t)),   # x tile
                pl.BlockSpec((C, 1), lambda n, t: (0, 0)),            # ws (resident)
                pl.BlockSpec(memory_space=pltpu.MemorySpace.SMEM),    # bs scalar in SMEM
            ],
            out_specs=pl.BlockSpec((1, C, thw2), lambda n, t: (n, 0, t)),
        ),
        compiler_params=pltpu.CompilerParams(
            dimension_semantics=("parallel", "parallel"),
            vmem_limit_bytes=vmem_limit,
        ),
    )(cse, x, ws_k, bs_k)

    if hw_pad != HW:
        out = out[:, :, :HW]
    return out.reshape(N, C, H, W)


# --------------------------------- reference & test ---------------------------------
def make_params(key, in_channels, reduction=16):
    """Deterministic synthetic init matching SCSEModule.__init__ (PyTorch conv shapes)."""
    cr = max(in_channels // reduction, 1)
    k1, k2, k3, k4, k5, k6 = jax.random.split(key, 6)
    scale = 0.1
    w1 = scale * jax.random.normal(k1, (cr, in_channels), jnp.float32)   # Conv2d(C, Cr, 1)
    b1 = scale * jax.random.normal(k2, (cr,), jnp.float32)
    w2 = scale * jax.random.normal(k3, (in_channels, cr), jnp.float32)   # Conv2d(Cr, C, 1)
    b2 = scale * jax.random.normal(k4, (in_channels,), jnp.float32)
    ws = scale * jax.random.normal(k5, (1, in_channels), jnp.float32)    # Conv2d(C, 1, 1)
    bs = scale * jax.random.normal(k6, (1,), jnp.float32)
    return w1, b1, w2, b2, ws, bs


def scse_reference(x_nchw, params):
    """Pure-JAX reference mirroring the PyTorch forward."""
    w1, b1, w2, b2, ws, bs = params
    mean = jnp.mean(x_nchw, axis=(2, 3))                        # (N, C)
    h = jax.nn.relu(mean @ w1.T + b1)                           # (N, Cr)
    cse = jax.nn.sigmoid(h @ w2.T + b2)[:, :, None, None]       # (N, C, 1, 1)
    sse = jax.nn.sigmoid(
        jnp.einsum("nchw,oc->nohw", x_nchw, ws) + bs[None, :, None, None])  # (N, 1, H, W)
    return x_nchw * cse + x_nchw * sse


if __name__ == "__main__":
    key = jax.random.PRNGKey(0)
    kx1, kx2, kp = jax.random.split(key, 3)

    N, C = 2, 32
    params = make_params(kp, C, reduction=16)   # hidden channels = 2

    # Case 1: fused single-pass path (whole image resident in VMEM).
    x1 = jax.random.normal(kx1, (N, C, 32, 32), jnp.float32)
    out1 = jax.block_until_ready(scse_pallas(x1, params))
    ref1 = scse_reference(x1, params)
    assert out1.shape == x1.shape and out1.dtype == x1.dtype
    assert jnp.allclose(out1, ref1, atol=1e-4, rtol=1e-4), "fused path mismatch vs reference"

    # Case 2: tiled 2-pass fallback with HW padding (HW=400 is not a 128-multiple),
    # forced via an artificially tiny tile budget.
    x2 = jax.random.normal(kx2, (N, C, 20, 20), jnp.float32)
    out2 = jax.block_until_ready(scse_pallas(x2, params, vmem_budget=64 * 1024))
    ref2 = scse_reference(x2, params)
    assert out2.shape == x2.shape and out2.dtype == x2.dtype
    assert jnp.allclose(out2, ref2, atol=1e-4, rtol=1e-4), "tiled path mismatch vs reference"

    print("KERNEL_OK")
</pallas_src>

<mosaic_0001>
module attributes {stable_mosaic.version = 11 : i64} {
  func.func @_scse_fused_kernel(%arg0: i32, %arg1: memref<1x32x1024xf32, #tpu.memory_space<vmem>>, %arg2: memref<2x32xf32, #tpu.memory_space<vmem>>, %arg3: memref<2x1xf32, #tpu.memory_space<vmem>>, %arg4: memref<32x2xf32, #tpu.memory_space<vmem>>, %arg5: memref<32x1xf32, #tpu.memory_space<vmem>>, %arg6: memref<32x1xf32, #tpu.memory_space<vmem>>, %arg7: memref<1xf32, #tpu.memory_space<smem>>, %arg8: memref<1x32x1024xf32, #tpu.memory_space<vmem>>) attributes {dimension_semantics = [#tpu.dimension_semantics<parallel>], iteration_bounds = array<i64: 2>, scalar_prefetch = 0 : i64, scratch_operands = 0 : i64, tpu.core_type = #tpu.core_type<tc>, window_params = [{transform_indices = @transform_0, window_bounds = array<i64: 1, 32, 1024>}, {pipeline_mode = #tpu.pipeline_mode<synchronous>, transform_indices = @transform_1, window_bounds = array<i64: 2, 32>}, {pipeline_mode = #tpu.pipeline_mode<synchronous>, transform_indices = @transform_2, window_bounds = array<i64: 2, 1>}, {pipeline_mode = #tpu.pipeline_mode<synchronous>, transform_indices = @transform_3, window_bounds = array<i64: 32, 2>}, {pipeline_mode = #tpu.pipeline_mode<synchronous>, transform_indices = @transform_4, window_bounds = array<i64: 32, 1>}, {pipeline_mode = #tpu.pipeline_mode<synchronous>, transform_indices = @transform_5, window_bounds = array<i64: 32, 1>}, {transform_indices = @transform_6, window_bounds = array<i64: 1>}, {transform_indices = @transform_7, window_bounds = array<i64: 1, 32, 1024>}]} {
    %c0 = arith.constant 0 : index
    %c0_0 = arith.constant 0 : index
    %c0_1 = arith.constant 0 : index
    %0 = vector.load %arg1[%c0, %c0_0, %c0_1] : memref<1x32x1024xf32, #tpu.memory_space<vmem>>, vector<1x32x1024xf32>
    %1 = vector.shape_cast %0 : vector<1x32x1024xf32> to vector<32x1024xf32>
    %cst = arith.constant dense<0.000000e+00> : vector<32xf32>
    %2 = vector.multi_reduction <add>, %1, %cst [1] : vector<32x1024xf32> to vector<32xf32>
    %3 = vector.shape_cast %2 : vector<32xf32> to vector<32x1xf32>
    %cst_2 = arith.constant 9.765625E-4 : f32
    %4 = vector.broadcast %cst_2 : f32 to vector<32x1xf32>
    %5 = arith.mulf %3, %4 : vector<32x1xf32>
    %c0_3 = arith.constant 0 : index
    %c0_4 = arith.constant 0 : index
    %6 = vector.load %arg2[%c0_3, %c0_4] : memref<2x32xf32, #tpu.memory_space<vmem>>, vector<2x32xf32>
    %cst_5 = arith.constant dense<0.000000e+00> : vector<2x1xf32>
    %7 = tpu.matmul %6, %5, %cst_5 {dimension_numbers = #tpu.dot_dimension_numbers<[1], [0], [0], [1], [0, 0, 1, 1], [], []>} : vector<2x32xf32>, vector<32x1xf32>, vector<2x1xf32> -> vector<2x1xf32>
    %c0_6 = arith.constant 0 : index
    %c0_7 = arith.constant 0 : index
    %8 = vector.load %arg3[%c0_6, %c0_7] : memref<2x1xf32, #tpu.memory_space<vmem>>, vector<2x1xf32>
    %9 = arith.addf %7, %8 : vector<2x1xf32>
    %cst_8 = arith.constant 0.000000e+00 : f32
    %10 = vector.broadcast %cst_8 : f32 to vector<2x1xf32>
    %11 = arith.maximumf %9, %10 : vector<2x1xf32>
    %c0_9 = arith.constant 0 : index
    %c0_10 = arith.constant 0 : index
    %12 = vector.load %arg4[%c0_9, %c0_10] : memref<32x2xf32, #tpu.memory_space<vmem>>, vector<32x2xf32>
    %cst_11 = arith.constant dense<0.000000e+00> : vector<32x1xf32>
    %13 = tpu.matmul %12, %11, %cst_11 {dimension_numbers = #tpu.dot_dimension_numbers<[1], [0], [0], [1], [0, 0, 1, 1], [], []>} : vector<32x2xf32>, vector<2x1xf32>, vector<32x1xf32> -> vector<32x1xf32>
    %c0_12 = arith.constant 0 : index
    %c0_13 = arith.constant 0 : index
    %14 = vector.load %arg5[%c0_12, %c0_13] : memref<32x1xf32, #tpu.memory_space<vmem>>, vector<32x1xf32>
    %15 = arith.addf %13, %14 : vector<32x1xf32>
    %16 = arith.negf %15 : vector<32x1xf32>
    %17 = math.exp %16 : vector<32x1xf32>
    %cst_14 = arith.constant 1.000000e+00 : f32
    %18 = vector.broadcast %cst_14 : f32 to vector<32x1xf32>
    %19 = arith.addf %18, %17 : vector<32x1xf32>
    %20 = arith.divf %18, %19 : vector<32x1xf32>
    %c0_15 = arith.constant 0 : index
    %c0_16 = arith.constant 0 : index
    %21 = vector.load %arg6[%c0_15, %c0_16] : memref<32x1xf32, #tpu.memory_space<vmem>>, vector<32x1xf32>
    %22 = vector.broadcast %21 : vector<32x1xf32> to vector<32x1024xf32>
    %23 = arith.mulf %1, %22 : vector<32x1024xf32>
    %cst_17 = arith.constant dense<0.000000e+00> : vector<1024xf32>
    %24 = vector.multi_reduction <add>, %23, %cst_17 [0] : vector<32x1024xf32> to vector<1024xf32>
    %25 = vector.shape_cast %24 : vector<1024xf32> to vector<1x1024xf32>
    %c0_18 = arith.constant 0 : index
    %26 = memref.load %arg7[%c0_18] : memref<1xf32, #tpu.memory_space<smem>>
    %27 = vector.broadcast %26 : f32 to vector<1x1024xf32>
    %28 = arith.addf %25, %27 : vector<1x1024xf32>
    %29 = arith.negf %28 : vector<1x1024xf32>
    %30 = math.exp %29 : vector<1x1024xf32>
    %cst_19 = arith.constant 1.000000e+00 : f32
    %31 = vector.broadcast %cst_19 : f32 to vector<1x1024xf32>
    %32 = arith.addf %31, %30 : vector<1x1024xf32>
    %33 = arith.divf %31, %32 : vector<1x1024xf32>
    %34 = vector.broadcast %20 : vector<32x1xf32> to vector<32x1024xf32>
    %35 = vector.broadcast %33 : vector<1x1024xf32> to vector<32x1024xf32>
    %36 = arith.addf %34, %35 : vector<32x1024xf32>
    %37 = arith.mulf %1, %36 : vector<32x1024xf32>
    %c0_20 = arith.constant 0 : index
    %c0_21 = arith.constant 0 : index
    %c0_22 = arith.constant 0 : index
    %38 = vector.load %arg8[%c0_20, %c0_21, %c0_22] : memref<1x32x1024xf32, #tpu.memory_space<vmem>>, vector<1x32x1024xf32>
    %39 = vector.shape_cast %38 : vector<1x32x1024xf32> to vector<32x1024xf32>
    %40 = vector.shape_cast %37 : vector<32x1024xf32> to vector<1x32x1024xf32>
    tpu.vector_store %arg8[%c0_20, %c0_21, %c0_22], %40 {strides = array<i32>} : memref<1x32x1024xf32, #tpu.memory_space<vmem>>, vector<1x32x1024xf32>,
    return
  }
  func.func @transform_0(%arg0: i32) -> (i32, i32, i32) {
    %c0_i32 = arith.constant 0 : i32
    %c0_i32_0 = arith.constant 0 : i32
    %c0_i32_1 = arith.constant 0 : i32
    return %arg0, %c0_i32, %c0_i32_0 : i32, i32, i32
  }
  func.func @transform_1(%arg0: i32) -> (i32, i32) {
    %c0_i32 = arith.constant 0 : i32
    %c0_i32_0 = arith.constant 0 : i32
    %c0_i32_1 = arith.constant 0 : i32
    return %c0_i32, %c0_i32_0 : i32, i32
  }
  func.func @transform_2(%arg0: i32) -> (i32, i32) {
    %c0_i32 = arith.constant 0 : i32
    %c0_i32_0 = arith.constant 0 : i32
    %c0_i32_1 = arith.constant 0 : i32
    return %c0_i32, %c0_i32_0 : i32, i32
  }
  func.func @transform_3(%arg0: i32) -> (i32, i32) {
    %c0_i32 = arith.constant 0 : i32
    %c0_i32_0 = arith.constant 0 : i32
    %c0_i32_1 = arith.constant 0 : i32
    return %c0_i32, %c0_i32_0 : i32, i32
  }
  func.func @transform_4(%arg0: i32) -> (i32, i32) {
    %c0_i32 = arith.constant 0 : i32
    %c0_i32_0 = arith.constant 0 : i32
    %c0_i32_1 = arith.constant 0 : i32
    return %c0_i32, %c0_i32_0 : i32, i32
  }
  func.func @transform_5(%arg0: i32) -> (i32, i32) {
    %c0_i32 = arith.constant 0 : i32
    %c0_i32_0 = arith.constant 0 : i32
    %c0_i32_1 = arith.constant 0 : i32
    return %c0_i32, %c0_i32_0 : i32, i32
  }
  func.func @transform_6(%arg0: i32) -> i32 {
    %c0_i32 = arith.constant 0 : i32
    %c0_i32_0 = arith.constant 0 : i32
    return %c0_i32 : i32
  }
  func.func @transform_7(%arg0: i32) -> (i32, i32, i32) {
    %c0_i32 = arith.constant 0 : i32
    %c0_i32_0 = arith.constant 0 : i32
    %c0_i32_1 = arith.constant 0 : i32
    return %arg0, %c0_i32, %c0_i32_0 : i32, i32, i32
  }
}

</mosaic_0001>

<bundles_post_ra>
// kernel: tpu_custom_call.1
= control target key start
LH: loop header
LB: loop body
LE: loop exit
PB: predicated region body
PF: predicated region fallthrough
CT: control target
= control target key end

     0   :  { %s2063_s0 = inlined_call_operand.hbm [shape: f32[2,32,1024], index: 0, kind: input, shape index: {}]   ;;  %s2064_s1 = inlined_call_operand.vmem [shape: f32[2,32], index: 1, kind: input, shape index: {}]   ;;  %s2065_s2 = inlined_call_operand.vmem [shape: f32[2,1], index: 2, kind: input, shape index: {}]   ;;  %s2066_s3 = inlined_call_operand.vmem [shape: f32[32,2], index: 3, kind: input, shape index: {}]   ;;  %s2067_s4 = inlined_call_operand.vmem [shape: f32[32,1], index: 4, kind: input, shape index: {}]   ;;  %s2068_s5 = inlined_call_operand.vmem [shape: f32[32,1], index: 5, kind: input, shape index: {}]   ;;  %s2069_s6 = inlined_call_operand.<no memory space> [shape: f32[1], index: 6, kind: input, shape index: {}]   ;;  %s2070_s7 = inlined_call_operand.hbm [shape: f32[2,32,1024], index: 7, kind: output, shape index: {}]  }
   0x1   :  { %12 = sst [smem:[#allocation2]] %s2069_s6 }
   0x2   :  { %13 = vsyncpa [#allocation4], 0 }
   0x3   :  { %15 = vsyncpa [#allocation4 + $0x1], 0 }
   0x4   :  { %16 = vsyncpa [#allocation5], 0 }
   0x5   :  { %18 = vsyncpa [#allocation5 + $0x1], 0  ;;  %s1319_s26 = smov 0   ;;  %s1321_s27 = smov 0  }
   0x6   :  { %s1323_s28 = smov 0   ;;  %s1325_s29 = smov 0  }
   0x7 LB: > { %s1340_s6 = sadd.s32 4294967295, %s1269_s29   ;;  %s1024_s30 = sadd.s32 4294967294, %s1269_s29   ;;  %s1269_s29 = sphi %s1325_s29, %s2163_s29   ;;  %s1265_s28 = sphi %s1323_s28, %s2162_s28   ;;  %s1261_s27 = sphi %s1321_s27, %s2161_s27   ;;  %s1257_s26 = sphi %s1319_s26, %s2160_s26  }
   0x8   : > { %s1344_s8 = sadd.s32 1, %s1269_s29   ;;  %s31_s9 = sadd.s32 1, %s1265_s28 }
   0x9   : > { %s28_s10 = ssub.s32 %s1269_s29, %s1344_s8  ;;  %p38_p0 = scmp.ne.s32.totalorder %s1265_s28, %s1261_s27 }
   0xa   : > { %p29_p1 = scmp.eq.s32.totalorder %s28_s10, 0  ;;  %p39_p2 = scmp.eq.s32.totalorder %s1269_s29, 0 }
   0xb   : > { %p44_p3 = scmp.ne.s32.totalorder %s1261_s27, %s1257_s26  ;;  %p45_p4 = scmp.eq.s32.totalorder %s1340_s6, 0 }
   0xc   : > { %s1356_s11 = scalar_select %p29_p1, %s1265_s28, %s31_s9  }
   0xd   : > { %p1358_p5 = por %p39_p2, %p38_p0  ;;  %p1362_p6 = por %p45_p4, %p44_p3 }
   0xe   : > { %p194_p7 = scmp.eq.s32.totalorder %s1340_s6, 1  ;;  %p200_p8 = scmp.eq.s32.totalorder %s1024_s30, 1 }
   0xf   : > { %p1072_p10 = scmp.lt.s32.totalorder %s1269_s29, 2  ;;  %s238_s16 = sand.u32 1, %s1265_s28  }
  0x10   : > { %p1369_p11 = por %p194_p7, %p38_p0  ;;  %p1373_p12 = por %p200_p8, %p44_p3 }
  0x11   : > { %s1056_s17 = sshll.u32 %s1269_s29, 8  ;;  %s1027_s18 = sshll.u32 %s238_s16, 8 }
  0x12   : > { %s247_s21 = scalar_lea.hbm %s2063_s0, %s1056_s17  ;;  %s242_s23 = scalar_lea.vmem [#allocation3], %s1027_s18 }
  0x13   : > { %s248_s22 = sshll.u32 %s247_s21, 4  ;;  %s250_s24 = sshll.u32 %s242_s23, 4  ;;  %s249_s22 = int_to_ptr.hbm [resolvable:$true] %s248_s22  ;;  %s251_s24 = int_to_ptr.vmem [resolvable:$true] %s250_s24 }
  0x14   : > { %p1384_p13 = pnand %p1072_p10, %p1358_p5  ;;  %p1030_p0 = scmp.ge.s32.totalorder %s1269_s29, 1 }
  0x15   : > { %p258_p1 = scmp.lt.s32.totalorder %s1269_s29, 3  ;;  %s239_s30 = scalar_lea.sflag [#allocation4], %s238_s16 }
  0x16   : > { %s1173_s9 = sshra.s32 %s249_s22, 4  ;;  %p1177_p3 = pneg %p1384_p13  ;;  %s1174_s9 = int_to_ptr.hbm [resolvable:$true] %s1173_s9 }
  0x17   : > { %s1175_s10 = scalar_lea.hbm %s1174_s9, 256  ;;  %s1180_s12 = scalar_lea.hbm %s2063_s0, 512 }
  0x18   : > { %p1176_p2 = scmp.ne.s32.totalorder %s1174_s9, %s1175_s10  ;;  %p1181_p5 = scmp.lt.s32.totalorder %s1174_s9, %s2063_s0 }
  0x19   : > { %p1182_p8 = scmp.lt.s32.totalorder %s1180_s12, %s1175_s10 }
  0x1a   : > { %p1178_p4 = pnand %p1177_p3, %p1176_p2 }
  0x1b   : > { %p1183_p10 = por %p1182_p8, %p1181_p5 }
  0x1c   : > { %p1179_p7 = pneg %p1178_p4 }
  0x1e   : > { %p1184_p9 = pnand %p1183_p10, %p1179_p7 }
  0x20   : > { %1187 = shalt.err (!%p1184_p9)
}
  0x21   : > { %s1271_s16 = smov 1024   ;;  %s1272_s21 = smov 64  }
  0x22   : > { %1067 = dma.hbm_to_vmem [thread:$0]  (!%p1384_p13), %s249_s22, 4096, %s251_s24, %s239_s30, %s1271_s16, %s1271_s16, %s1272_s21  }
  0x23   : > { %p259_p2 = pnand %p1030_p0, %p258_p1 }
  0x25   : > { %262 = sbr.rel (%p259_p2) target bundleno = 609 (0x261), region = 48 }
  0x2a   : > { %s1405_s23 = sand.u32 1, %s1261_s27  }
  0x2b   : > { %s1031_s9 = sshll.u32 %s1405_s23, 8  ;;  %s265_s10 = scalar_lea.sflag [#allocation4], %s1405_s23 }
  0x2c   : > { %s1411_s17 = scalar_lea.vmem [#allocation3], %s1031_s9 }
  0x2d   : > { %1248 = dma.done.wait (%p1362_p6), %s265_s10, 4096  }
  0x2e   : > { %1250 = vsyncadd (%p1362_p6), %s265_s10, 4294963200  ;;  %v1418_v0 = vld [vmem:[%s1411_s17 + $0xc0] sm:$0xff]  ;;  %v1421_v1 = vld [vmem:[%s1411_s17 + $0xc8] sm:$0xff]  ;;  %vm374_vm0 = vcmask 261120   ;;  %vm420_vm1 = vcmask 1041408   ;;  %vm407_vm2 = vcmask 15360  }
  0x2f   : > { %v1424_v2 = vld [vmem:[%s1411_s17 + $0xd0] sm:$0xff]  ;;  %v359_v3 = vadd.f32 %v1421_v1, %v1418_v0  ;;  %v1429_v4 = vld [vmem:[%s1411_s17 + $0xd8] sm:$0xff]  ;;  %v1432_v5 = vld [vmem:[%s1411_s17 + $0x40] sm:$0xff]  ;;  %s657_s30 = sld [smem:[#allocation2]]  ;;  %s1944_s18 = scalar_lea.vmem [#allocation6], %s1031_s9 }
  0x30   : > { %2091 = vst [vmem:[#allocation9_spill] sm:$0xff] %v1432_v5  ;;  %v1436_v7 = vld [vmem:[%s1411_s17 + $0x48] sm:$0xff]  ;;  %v1439_v8 = vld [vmem:[%s1411_s17 + $0x50] sm:$0xff]  ;;  %v1442_v9 = vld [vmem:[%s1411_s17 + $0xe0] sm:$0xff]  ;;  %s1057_s9 = sshll.u32 %s1340_s6, 8  ;;  %s948_s20 = sshll.u32 %s1944_s18, 4  ;;  %s949_s20 = int_to_ptr.vmem [resolvable:$true] %s948_s20 }
  0x31   : > { %v360_v6 = vadd.f32 %v359_v3, %v1424_v2  ;;  %2092 = vst [vmem:[#allocation10_spill] sm:$0xff] %v1436_v7  ;;  %v341_v10 = vadd.f32 %v1436_v7, %v1432_v5  ;;  %v1448_v12 = vld [vmem:[%s1411_s17 + $0x58] sm:$0xff]  ;;  %v1451_v13 = vld [vmem:[%s1411_s17 + $0x80] sm:$0xff]  ;;  %v1454_v14 = vld [vmem:[%s1411_s17 + $0x88] sm:$0xff]  ;;  %s947_s19 = scalar_lea.hbm %s2070_s7, %s1057_s9  ;;  %s936_s21 = scalar_lea.sflag [#allocation5], %s1405_s23 }
  0x32   : > { %2093 = vst [vmem:[#allocation11_spill] sm:$0xff] %v1439_v8  ;;  %v1457_v15 = vld [vmem:[%s1411_s17 + $0xe8] sm:$0xff]  ;;  %v1461_v17 = vld [vmem:[%s1411_s17 + $0x90] sm:$0xff]  ;;  %v350_v18 = vadd.f32 %v1454_v14, %v1451_v13  ;;  %v1470_v21 = vld [vmem:[%s1411_s17 + $0x60] sm:$0xff]  ;;  %s950_s16 = sshll.u32 %s947_s19, 4  ;;  %s951_s16 = int_to_ptr.hbm [resolvable:$true] %s950_s16 }
  0x33   : > { %v361_v11 = vadd.f32 %v360_v6, %v1429_v4  ;;  %2094 = vst [vmem:[#allocation12_spill] sm:$0xff] %v1448_v12  ;;  %v342_v16 = vadd.f32 %v341_v10, %v1439_v8  ;;  %v1466_v19 = vld [vmem:[%s1411_s17 + $0xf0] sm:$0xff]  ;;  %v1473_v22 = vld [vmem:[%s1411_s17 + $0x98] sm:$0xff]  ;;  %v1478_v25 = vld [vmem:[%s1411_s17] sm:$0xff]  ;;  %s1217_s10 = sshra.s32 %s951_s16, 4  ;;  %s1218_s10 = int_to_ptr.hbm [resolvable:$true] %s1217_s10 }
  0x34   : > { %2095 = vst [vmem:[#allocation13_spill] sm:$0xff] %v1470_v21  ;;  %v351_v24 = vadd.f32 %v350_v18, %v1461_v17  ;;  %v1481_v26 = vld [vmem:[%s1411_s17 + $0x8] sm:$0xff]  ;;  %v1484_v27 = vld [vmem:[%s1411_s17 + $0x10] sm:$0xff]  ;;  %v1491_v30 = vld [vmem:[%s1411_s17 + $0xa0] sm:$0xff]  ;;  %s1219_s13 = scalar_lea.hbm %s1218_s10, 256  ;;  %p1224_p0 = scmp.lt.s32.totalorder %s1218_s10, %s2070_s7 }
  0x35   : > { %v362_v20 = vadd.f32 %v361_v11, %v1442_v9  ;;  %2096 = vst [vmem:[#allocation14_spill] sm:$0xff] %v1473_v22  ;;  %v343_v23 = vadd.f32 %v342_v16, %v1448_v12  ;;  %v1488_v29 = vld [vmem:[%s1411_s17 + $0x68] sm:$0xff]  ;;  %v332_v31 = vadd.f32 %v1481_v26, %v1478_v25  ;;  %v1496_v32 = vld [vmem:[%s1411_s17 + $0xf8] sm:$0xff]  ;;  %v1505_v37 = vld [vmem:[%s1411_s17 + $0x70] sm:$0xff]  ;;  %p1220_p6 = scmp.ne.s32.totalorder %s1218_s10, %s1219_s13 }
  0x36   : > { %2097 = vst [vmem:[#allocation15_spill] sm:$0xff] %v1488_v29  ;;  %v352_v34 = vadd.f32 %v351_v24, %v1473_v22  ;;  %v1501_v35 = vld [vmem:[%s1411_s17 + $0x18] sm:$0xff]  ;;  %v1508_v38 = vld [vmem:[%s1411_s17 + $0xa8] sm:$0xff]  ;;  %v1514_v42 = vld [vmem:[%s1411_s17 + $0x20] sm:$0xff] }
  0x37   : > { %v363_v28 = vadd.f32 %v362_v20, %v1457_v15  ;;  %2098 = vst [vmem:[#allocation16_spill] sm:$0xff] %v1491_v30  ;;  %v344_v33 = vadd.f32 %v343_v23, %v1470_v21  ;;  %v333_v39 = vadd.f32 %v332_v31, %v1484_v27  ;;  %v1518_v44 = vld [vmem:[%s1411_s17 + $0x78] sm:$0xff]  ;;  %v1521_v45 = vld [vmem:[%s1411_s17 + $0xb0] sm:$0xff]  ;;  %v1527_v49 = vld [vmem:[%s1411_s17 + $0x28] sm:$0xff]  ;;  %v1273_v23 = vmov 0   ;;  %p1221_p9 = pnand %p1220_p6, %p1369_p11 }
  0x38   : > { %2099 = vst [vmem:[#allocation17_spill] sm:$0xff] %v1505_v37  ;;  %v353_v41 = vadd.f32 %v352_v34, %v1491_v30  ;;  %v1532_v52 = vld [vmem:[%s1411_s17 + $0xb8] sm:$0xff]  ;;  %v1536_v54 = vld [vmem:[%s1411_s17 + $0x30] sm:$0xff]  ;;  %v372_v16 = vld [vmem:[%s2064_s1] sm:$0x3]  ;;  %1112 = vset.pattern.permute.xlu0 %v1273_v23  ;;  %1113 = vset.pattern.permute.xlu1 %v1273_v23 }
  0x39   : > { %v364_v36 = vadd.f32 %v363_v28, %v1466_v19  ;;  %2100 = vst [vmem:[#allocation18_spill] sm:$0xff] %v1508_v38  ;;  %v345_v40 = vadd.f32 %v344_v33, %v1488_v29  ;;  %v334_v46 = vadd.f32 %v333_v39, %v1501_v35  ;;  %v1541_v57 = vld [vmem:[%s1411_s17 + $0x38] sm:$0xff]  ;;  %v531_v18 = vld [vmem:[%s2068_s5 + $0x10] sm:$0xff]  ;;  %v529_v24 = vld [vmem:[%s2068_s5] sm:$0xff]  ;;  %1111 = vset.pattern.permute.xlu2 %v1273_v23  ;;  %p1222_p13 = pneg %p1221_p9 }
  0x3a   : > { %2101 = vst [vmem:[#allocation19_spill] sm:$0xff] %v1518_v44  ;;  %v354_v48 = vadd.f32 %v353_v41, %v1508_v38  ;;  %v532_v20 = vld [vmem:[%s2068_s5 + $0x18] sm:$0xff]  ;;  %535 = vperm.xlu2 %1111, %v529_v24   ;;  %v530_v28 = vld [vmem:[%s2068_s5 + $0x8] sm:$0xff]  ;;  %v373_v31 = vld [vmem:[%s2065_s2] sm:$0x3] }
  0x3b   : > { %v365_v43 = vadd.f32 %v364_v36, %v1496_v32  ;;  %2102 = vst [vmem:[#allocation20_spill] sm:$0xff] %v1521_v45  ;;  %v346_v47 = vadd.f32 %v345_v40, %v1505_v37  ;;  %v335_v50 = vadd.f32 %v334_v46, %v1514_v42  ;;  %v399_v39 = vld [vmem:[%s2066_s3] sm:$0xff]  ;;  %v400_v40 = vld [vmem:[%s2066_s3 + $0x8] sm:$0xff]  ;;  %v402_v41 = vld [vmem:[%s2066_s3 + $0x18] sm:$0xff] }
  0x3c   : > { %2103 = vst [vmem:[#allocation21_spill] sm:$0xff] %v1532_v52  ;;  %v355_v53 = vadd.f32 %v354_v48, %v1521_v45  ;;  %v403_v46 = vld [vmem:[%s2067_s4] sm:$0xff] }
  0x3d   : > { %366 = vadd.xlane.f32.xlu0 %v365_v43  ;;  %v347_v51 = vadd.f32 %v346_v47, %v1518_v44  ;;  %2104 = vst [vmem:[#allocation22_spill] sm:$0xff] %v1536_v54  ;;  %v336_v55 = vadd.f32 %v335_v50, %v1527_v49  ;;  %v401_v43 = vld [vmem:[%s2066_s3 + $0x10] sm:$0xff] }
  0x3e   : > { %v356_v56 = vadd.f32 %v355_v53, %v1532_v52  ;;  %2105 = vst [vmem:[#allocation23_spill] sm:$0xff] %v1541_v57  ;;  %v406_v53 = vld [vmem:[%s2067_s4 + $0x18] sm:$0xff] }
  0x3f   : > { %348 = vadd.xlane.f32.xlu1 %v347_v51  ;;  %v337_v58 = vadd.f32 %v336_v55, %v1536_v54  ;;  %v404_v51 = vld [vmem:[%s2067_s4 + $0x8] sm:$0xff] }
  0x41   : > { %v338_v59 = vadd.f32 %v337_v58, %v1541_v57 }
  0x42   : > { %540 = vperm.xlu2 %1111, %v530_v28  }
  0x45   : > { %357 = vadd.xlane.f32.xlu0 %v356_v56 }
  0x47   : > { %339 = vadd.xlane.f32.xlu1 %v338_v59 }
  0x59   : > { %545 = vperm.xlu0 %1112, %v531_v18  }
  0x60   : > { %550 = vperm.xlu1 %1113, %v532_v20  }
  0xb0   : > { %v367_v60 = vpop.xlane.xlu0 %366 }
  0xb1   : > { %v371_v61 = vmul.f32 0.0009765625, %v367_v60 }
  0xb2   : > { %v349_v62 = vpop.xlane.xlu1 %348 }
  0xb3   : > { %390 = vmatpush.msra.mxu0 %v371_v61  ;;  %v369_v6 = vmul.f32 0.0009765625, %v349_v62 }
  0xb8   : > { %v358_v63 = vpop.xlane.xlu0 %357 }
  0xb9   : > { %v370_v3 = vmul.f32 0.0009765625, %v358_v63 }
  0xba   : > { %v340_v10 = vpop.xlane.xlu1 %339 }
  0xbb   : > { %391 = vmatpush.msra.mxu0 %v370_v3  ;;  %v368_v11 = vmul.f32 0.0009765625, %v340_v10  ;;  %v405_v3 = vld [vmem:[%s2067_s4 + $0x10] sm:$0xff] }
  0xbd   : > { %392 = vmatpush.msra.mxu0 %v369_v6 }
  0xbf   : > { %393 = vmatpush.msra.mxu0 %v368_v11 }
  0xc0   : > { %1033 = vmatmul.msk.f32.vlgmr.msra.gmra.mxu0 %vm374_vm0, %v372_v16 }
 0x13d   : > { %v395_v33 = vpop.f32.mrf.mxu0 }
 0x13e   : > { %v396_v34 = vadd.f32 %v395_v33, %v373_v31 }
 0x140   : > { %v398_v36 = vmax.f32 %v396_v34, 0.0 }
 0x142   : > { %1034 = vmatpush.msk.msra.mxu1 %vm420_vm1, %v398_v36  ;;  %1058 = vmatpush.msk.msra.mxu2 %vm420_vm1, %v398_v36 }
 0x143   : > { %1059 = vmatpush.msk.msra.mxu3 %vm420_vm1, %v398_v36  ;;  %1035 = vmatmul.msk.f32.vlgmr.msra.gmra.mxu1 %vm407_vm2, %v399_v39  ;;  %v536_v39 = vpop.permute.xlu2 %535 }
 0x144   : > { %1036 = vmatmul.msk.f32.vlgmr.msra.gmra.mxu2 %vm407_vm2, %v400_v40  ;;  %1038 = vmatmul.msk.f32.vlgmr.msra.gmra.mxu3 %vm407_vm2, %v402_v41 }
 0x14c   : > { %1037 = vmatmul.msk.f32.gmra.mxu2 %vm407_vm2, %v401_v43 }
 0x1c0   : > { %v441_v47 = vpop.f32.mrf.mxu1 }
 0x1c1   : > { %v442_v48 = vadd.f32 %v441_v47, %v403_v46 }
 0x1c3   : > { %v1039_v50 = vmul.f32 -1.442695, %v442_v48 }
 0x1c5   : > { %1114 = vpow2.f32 %v1039_v50 }
 0x1c7   : > { %v444_v55 = vpop.f32.mrf.mxu2  ;;  %v450_v56 = vpop.f32.mrf.mxu3 }
 0x1c8   : > { %v445_v58 = vadd.f32 %v444_v55, %v404_v51  ;;  %v451_v59 = vadd.f32 %v450_v56, %v406_v53  ;;  %v553_v53 = vmul.f32 %v536_v39, %v1478_v25  ;;  %v554_v55 = vmul.f32 %v536_v39, %v1481_v26  ;;  %v546_v56 = vpop.permute.xlu0 %545 }
 0x1c9   : > { %v572_v40 = vmul.f32 %v546_v56, %v1473_v22 }
 0x1ca   : > { %v1040_v60 = vmul.f32 -1.442695, %v445_v58  ;;  %v1042_v61 = vmul.f32 -1.442695, %v451_v59 }
 0x1cb   : > { %v1115_v62 = vpop.eup %1114 }
 0x1cc   : > { %v465_v63 = vadd.f32 1.0, %v1115_v62  ;;  %1116 = vpow2.f32 %v1040_v60  ;;  %v556_v62 = vmul.f32 %v536_v39, %v1501_v35 }
 0x1cd   : > { %1118 = vpow2.f32 %v1042_v61  ;;  %v555_v61 = vmul.f32 %v536_v39, %v1484_v27 }
 0x1ce   : > { %1120 = vrcp.f32 %v465_v63  ;;  %v478_v28 = vand.u32 2147483647, %v465_v63  ;;  %v480_v31 = vand.u32 2147483648, %v465_v63  ;;  %vm474_vm3 = vweird.f32 %v465_v63 }
 0x1cf   : > { %v447_v6 = vpop.f32.mrf.mxu2 }
 0x1d0   : > { %v448_v10 = vadd.f32 %v447_v6, %v405_v3  ;;  %vm1594_vm4 = vcmp.eq.f32.partialorder %v478_v28, 8.507059e+37  ;;  %v481_v41 = vor.u32 1.1754944e-38, %v480_v31  ;;  %v560_v31 = vmul.f32 %v536_v39, %v1541_v57 }
 0x1d2   : > { %v1117_v11 = vpop.eup %1116  ;;  %v1041_v16 = vmul.f32 -1.442695, %v448_v10  ;;  %v557_v10 = vmul.f32 %v536_v39, %v1514_v42 }
 0x1d3   : > { %v1119_v18 = vpop.eup %1118  ;;  %v1587_v20 = vadd.f32 1.0, %v1117_v11  ;;  %v558_v11 = vmul.f32 %v536_v39, %v1527_v49 }
 0x1d4   : > { %v1121_v23 = vpop.eup %1120  ;;  %v1589_v24 = vadd.f32 1.0, %v1119_v18  ;;  %1122 = vpow2.f32 %v1041_v16  ;;  %v559_v16 = vmul.f32 %v536_v39, %v1536_v54  ;;  %v571_v39 = vmul.f32 %v546_v56, %v1461_v17 }
 0x1d5   : > { %1124 = vrcp.f32 %v1587_v20  ;;  %v470_v33 = vmul.f32 %v1121_v23, %v465_v63  ;;  %v495_v34 = vand.u32 2147483648, %v1587_v20  ;;  %vm475_vm5 = vweird.f32 %v1121_v23 }
 0x1d6   : > { %1126 = vrcp.f32 %v1589_v24  ;;  %v493_v46 = vand.u32 2147483647, %v1587_v20  ;;  %vm489_vm6 = vweird.f32 %v1587_v20  ;;  %vm476_vm7 = vmor %vm474_vm3, %vm475_vm5  ;;  %v569_v63 = vmul.f32 %v546_v56, %v1451_v13 }
 0x1d7   : > { %v471_v36 = vsub.f32 1.0, %v470_v33  ;;  %v496_v50 = vor.u32 1.1754944e-38, %v495_v34  ;;  %vm519_vm14 = vweird.f32 %v1589_v24 }
 0x1d8   : > { %vm1617_vm8 = vcmp.eq.f32.partialorder %v493_v46, 8.507059e+37  ;;  %v541_v46 = vpop.permute.xlu2 %540 }
 0x1d9   : > { %v472_v43 = vmul.f32 %v1121_v23, %v471_v36  ;;  %v562_v51 = vmul.f32 %v541_v46, %v1436_v7  ;;  %v564_v17 = vmul.f32 %v541_v46, %v1448_v12  ;;  %v568_v22 = vmul.f32 %v541_v46, %v1518_v44 }
 0x1da   : > { %v1123_v48 = vpop.eup %1122  ;;  %v576_v7 = vmul.f32 %v546_v56, %v1532_v52 }
 0x1db   : > { %v1125_v58 = vpop.eup %1124  ;;  %v1604_v59 = vadd.f32 1.0, %v1123_v48  ;;  %v473_v60 = vadd.f32 %v1121_v23, %v472_v43  ;;  %v570_v48 = vmul.f32 %v546_v56, %v1454_v14 }
 0x1dc   : > { %v1608_v3 = vpop.eup %1126  ;;  %v485_v6 = vmul.f32 %v1125_v58, %v1587_v20  ;;  %vm490_vm9 = vweird.f32 %v1125_v58  ;;  %v575_v20 = vmul.f32 %v546_v56, %v1521_v45 }
 0x1dd   : > { %1128 = vrcp.f32 %v1604_v59  ;;  %v477_v18 = vsel %vm476_vm7, %v1121_v23, %v473_v60  ;;  %v510_v36 = vand.u32 2147483648, %v1604_v59  ;;  %v515_v43 = vmul.f32 %v1608_v3, %v1589_v24  ;;  %vm1643_vm11 = vmor %vm489_vm6, %vm490_vm9 }
 0x1de   : > { %v482_v33 = vsel %vm1594_vm4, %v481_v41, %v477_v18  ;;  %v486_v34 = vsub.f32 1.0, %v485_v6  ;;  %v508_v23 = vand.u32 2147483647, %v1604_v59  ;;  %v573_v41 = vmul.f32 %v546_v56, %v1491_v30 }
 0x1df   : > { %821 = vperm.xlu2 %1111, %v482_v33   ;;  %v516_v13 = vsub.f32 1.0, %v515_v43  ;;  %v511_v6 = vor.u32 1.1754944e-38, %v510_v36  ;;  %v561_v18 = vmul.f32 %v541_v46, %v1432_v5  ;;  %v563_v33 = vmul.f32 %v541_v46, %v1439_v8 }
 0x1e0   : > { %v487_v60 = vmul.f32 %v1125_v58, %v486_v34  ;;  %vm504_vm10 = vweird.f32 %v1604_v59  ;;  %v565_v34 = vmul.f32 %v541_v46, %v1470_v21  ;;  %v566_v30 = vmul.f32 %v541_v46, %v1488_v29 }
 0x1e1   : > { %v517_v14 = vmul.f32 %v1608_v3, %v516_v13  ;;  %v574_v13 = vmul.f32 %v546_v56, %v1508_v38  ;;  %vm1654_vm12 = vcmp.eq.f32.partialorder %v508_v23, 8.507059e+37  ;;  %vm520_vm15 = vweird.f32 %v1608_v3 }
 0x1e2   : > { %v488_v47 = vadd.f32 %v1125_v58, %v487_v60  ;;  %v567_v60 = vmul.f32 %v541_v46, %v1505_v37  ;;  %v585_v46 = vadd.f32 %v561_v18, %v553_v53  ;;  %v594_v38 = vadd.f32 %v562_v51, %v554_v55  ;;  %v551_v37 = vpop.permute.xlu1 %550  ;;  %vm1690_vm2 = vmor %vm519_vm14, %vm520_vm15 }
 0x1e3   : > { %v1129_v43 = vpop.eup %1128  ;;  %v603_v44 = vadd.f32 %v563_v33, %v555_v61  ;;  %v612_v23 = vadd.f32 %v564_v17, %v556_v62  ;;  %v621_v36 = vadd.f32 %v565_v34, %v557_v10  ;;  %v1665_v45 = vadd.f32 %v1608_v3, %v517_v14 }
 0x1e4   : > { %v492_v12 = vsel %vm1643_vm11, %v1125_v58, %v488_v47  ;;  %v500_v21 = vmul.f32 %v1129_v43, %v1604_v59  ;;  %vm505_vm13 = vweird.f32 %v1129_v43  ;;  %v586_v56 = vadd.f32 %v585_v46, %v569_v63 }
 0x1e5   : > { %v497_v47 = vsel %vm1617_vm8, %v496_v50, %v492_v12  ;;  %v595_v52 = vadd.f32 %v594_v38, %v570_v48  ;;  %v604_v29 = vadd.f32 %v603_v44, %v571_v39  ;;  %v613_v57 = vadd.f32 %v612_v23, %v572_v40  ;;  %vm506_vm0 = vmor %vm504_vm10, %vm505_vm13 }
 0x1e6   : > { %v501_v58 = vsub.f32 1.0, %v500_v21  ;;  %v622_v54 = vadd.f32 %v621_v36, %v573_v41  ;;  %v630_v53 = vadd.f32 %v566_v30, %v558_v11  ;;  %v639_v51 = vadd.f32 %v567_v60, %v559_v16 }
 0x1e7   : > { %826 = vperm.xlu2 %1111, %v497_v47   ;;  %v648_v55 = vadd.f32 %v568_v22, %v560_v31  ;;  %v577_v61 = vmul.f32 %v551_v37, %v1418_v0  ;;  %v578_v12 = vmul.f32 %v551_v37, %v1421_v1  ;;  %v579_v62 = vmul.f32 %v551_v37, %v1424_v2 }
 0x1e8   : > { %v502_v5 = vmul.f32 %v1129_v43, %v501_v58  ;;  %v631_v50 = vadd.f32 %v630_v53, %v574_v13  ;;  %v580_v10 = vmul.f32 %v551_v37, %v1429_v4  ;;  %v2114_v38 = vand.u32 2147483647, %v1589_v24 }
 0x1e9   : > { %v640_v22 = vadd.f32 %v639_v51, %v575_v20  ;;  %v649_v0 = vadd.f32 %v648_v55, %v576_v7  ;;  %v581_v1 = vmul.f32 %v551_v37, %v1442_v9  ;;  %v583_v2 = vmul.f32 %v551_v37, %v1466_v19 }
 0x1ea   : > { %v503_v21 = vadd.f32 %v1129_v43, %v502_v5  ;;  %vm1676_vm1 = vcmp.eq.f32.partialorder %v2114_v38, 8.507059e+37  ;;  %v582_v5 = vmul.f32 %v551_v37, %v1457_v15  ;;  %v584_v4 = vmul.f32 %v551_v37, %v1496_v32 }
 0x1eb   : > { %v587_v11 = vadd.f32 %v586_v56, %v577_v61  ;;  %v596_v16 = vadd.f32 %v595_v52, %v578_v12  ;;  %v605_v28 = vadd.f32 %v604_v29, %v579_v62  ;;  %v614_v31 = vadd.f32 %v613_v57, %v580_v10 }
 0x1ec   : > { %v507_v44 = vsel %vm506_vm0, %v1129_v43, %v503_v21  ;;  %v623_v48 = vadd.f32 %v622_v54, %v581_v1  ;;  %v632_v39 = vadd.f32 %v631_v50, %v582_v5  ;;  %v641_v7 = vadd.f32 %v640_v22, %v583_v2 }
 0x1ed   : > { %v512_v59 = vsel %vm1654_vm12, %v511_v6, %v507_v44  ;;  %v588_v63 = vrot.slane %v587_v11, 4  ;;  %v597_v9 = vrot.slane %v596_v16, 4  ;;  %v606_v40 = vrot.slane %v605_v28, 4 }
 0x1ee   : > { %v615_v15 = vrot.slane %v614_v31, 4  ;;  %v650_v41 = vadd.f32 %v649_v0, %v584_v4  ;;  %v624_v29 = vrot.slane %v623_v48, 4  ;;  %v633_v32 = vrot.slane %v632_v39, 4 }
 0x1ef   : > { %831 = vperm.xlu2 %1111, %v512_v59   ;;  %v589_v8 = vadd.f32 %v588_v63, %v587_v11  ;;  %v642_v37 = vrot.slane %v641_v7, 4  ;;  %v598_v52 = vadd.f32 %v597_v9, %v596_v16  ;;  %v607_v54 = vadd.f32 %v606_v40, %v605_v28 }
 0x1f0   : > { %v616_v57 = vadd.f32 %v615_v15, %v614_v31  ;;  %v651_v6 = vrot.slane %v650_v41, 4  ;;  %v2119_v18 = vand.u32 2147483648, %v1589_v24  ;;  %v625_v17 = vadd.f32 %v624_v29, %v623_v48 }
 0x1f1   : > { %v590_v14 = vrot.slane %v589_v8, 2  ;;  %v634_v34 = vadd.f32 %v633_v32, %v632_v39  ;;  %v522_v43 = vsel %vm1690_vm2, %v1608_v3, %v1665_v45  ;;  %v599_v60 = vrot.slane %v598_v52, 2 }
 0x1f2   : > { %v526_v33 = vor.u32 1.1754944e-38, %v2119_v18  ;;  %v608_v13 = vrot.slane %v607_v54, 2  ;;  %v643_v20 = vadd.f32 %v642_v37, %v641_v7  ;;  %v617_v47 = vrot.slane %v616_v57, 2 }
 0x1f3   : > { %v591_v46 = vadd.f32 %v590_v14, %v589_v8  ;;  %v652_v58 = vadd.f32 %v651_v6, %v650_v41  ;;  %v600_v23 = vadd.f32 %v599_v60, %v598_v52  ;;  %v626_v36 = vrot.slane %v625_v17, 2 }
 0x1f4   : > { %v527_v24 = vsel %vm1676_vm1, %v526_v33, %v522_v43  ;;  %v635_v53 = vrot.slane %v634_v34, 2  ;;  %v609_v55 = vadd.f32 %v608_v13, %v607_v54  ;;  %v644_v61 = vrot.slane %v643_v20, 2 }
 0x1f5   : > { %v592_v56 = vrot.slane %v591_v46, 1  ;;  %v601_v51 = vrot.slane %v600_v23, 1  ;;  %v618_v21 = vadd.f32 %v617_v47, %v616_v57  ;;  %v653_v45 = vrot.slane %v652_v58, 2 }
 0x1f6   : > { %v658_v3 = vstv %s657_s30  ;;  %v627_v62 = vadd.f32 %v626_v36, %v625_v17  ;;  %v636_v10 = vadd.f32 %v635_v53, %v634_v34  ;;  %v610_v38 = vrot.slane %v609_v55, 1 }
 0x1f7   : > { %836 = vperm.xlu2 %1111, %v527_v24   ;;  %v593_v12 = vadd.f32 %v592_v56, %v591_v46  ;;  %v602_v50 = vadd.f32 %v601_v51, %v600_v23  ;;  %v645_v22 = vadd.f32 %v644_v61, %v643_v20  ;;  %v619_v0 = vrot.slane %v618_v21, 1 }
 0x1f8   : > { %v654_v1 = vadd.f32 %v653_v45, %v652_v58  ;;  %v628_v30 = vrot.slane %v627_v62, 1  ;;  %v637_v2 = vrot.slane %v636_v10, 1  ;;  %v611_v4 = vadd.f32 %v610_v38, %v609_v55 }
 0x1f9   : > { %v659_v5 = vadd.f32 %v658_v3, %v593_v12  ;;  %v660_v44 = vadd.f32 %v658_v3, %v602_v50  ;;  %v646_v11 = vrot.slane %v645_v22, 1  ;;  %v620_v59 = vadd.f32 %v619_v0, %v618_v21 }
 0x1fa   : > { %v655_v16 = vrot.slane %v654_v1, 1  ;;  %v629_v31 = vadd.f32 %v628_v30, %v627_v62  ;;  %v638_v48 = vadd.f32 %v637_v2, %v636_v10  ;;  %v661_v7 = vadd.f32 %v658_v3, %v611_v4 }
 0x1fb   : > { %v1043_v28 = vmul.f32 -1.442695, %v659_v5  ;;  %v1044_v63 = vmul.f32 -1.442695, %v660_v44  ;;  %v647_v39 = vadd.f32 %v646_v11, %v645_v22  ;;  %v662_v40 = vadd.f32 %v658_v3, %v620_v59 }
 0x1fc   : > { %v656_v9 = vadd.f32 %v655_v16, %v654_v1  ;;  %v663_v15 = vadd.f32 %v658_v3, %v629_v31  ;;  %v664_v41 = vadd.f32 %v658_v3, %v638_v48  ;;  %v1045_v8 = vmul.f32 -1.442695, %v661_v7 }
 0x1fd   : > { %1130 = vpow2.f32 %v1043_v28  ;;  %v665_v19 = vadd.f32 %v658_v3, %v647_v39  ;;  %v1046_v32 = vmul.f32 -1.442695, %v662_v40 }
 0x1fe   : > { %1132 = vpow2.f32 %v1044_v63  ;;  %v666_v29 = vadd.f32 %v658_v3, %v656_v9  ;;  %v1047_v37 = vmul.f32 -1.442695, %v663_v15  ;;  %v1048_v54 = vmul.f32 -1.442695, %v664_v41 }
 0x1ff   : > { %1134 = vpow2.f32 %v1045_v8  ;;  %v1049_v6 = vmul.f32 -1.442695, %v665_v19 }
 0x200   : > { %1136 = vpow2.f32 %v1046_v32  ;;  %v1050_v18 = vmul.f32 -1.442695, %v666_v29 }
 0x201   : > { %1138 = vpow2.f32 %v1047_v37 }
 0x202   : > { %1140 = vpow2.f32 %v1048_v54 }
 0x203   : > { %v1131_v52 = vpop.eup %1130  ;;  %1142 = vpow2.f32 %v1049_v6 }
 0x204   : > { %v1133_v57 = vpop.eup %1132  ;;  %v1702_v33 = vadd.f32 1.0, %v1131_v52  ;;  %1144 = vpow2.f32 %v1050_v18 }
 0x205   : > { %v1704_v14 = vadd.f32 1.0, %v1133_v57  ;;  %v1135_v17 = vpop.eup %1134 }
 0x206   : > { %1146 = vrcp.f32 %v1702_v33  ;;  %v1137_v34 = vpop.eup %1136  ;;  %v1708_v13 = vadd.f32 1.0, %v1135_v17  ;;  %vm704_vm3 = vweird.f32 %v1702_v33  ;;  %v710_v5 = vand.u32 2147483648, %v1702_v33 }
 0x207   : > { %1148 = vrcp.f32 %v1704_v14  ;;  %v1139_v43 = vpop.eup %1138  ;;  %v1710_v47 = vadd.f32 1.0, %v1137_v34  ;;  %vm719_vm5 = vweird.f32 %v1704_v14  ;;  %v725_v16 = vand.u32 2147483648, %v1704_v14 }
 0x208   : > { %v1141_v60 = vpop.eup %1140  ;;  %v1716_v36 = vadd.f32 1.0, %v1139_v43  ;;  %1150 = vrcp.f32 %v1708_v13  ;;  %v740_v28 = vand.u32 2147483648, %v1708_v13  ;;  %v708_v63 = vand.u32 2147483647, %v1702_v33 }
 0x209   : > { %v1143_v20 = vpop.eup %1142  ;;  %v1719_v24 = vadd.f32 1.0, %v1141_v60  ;;  %1152 = vrcp.f32 %v1710_v47  ;;  %v723_v39 = vand.u32 2147483647, %v1704_v14  ;;  %v1783_v40 = vor.u32 1.1754944e-38, %v710_v5  ;;  %v2150_v5 = vld [vmem:[#allocation13_spill] sm:$0xff] }
 0x20a   : > { %v1145_v46 = vpop.eup %1144  ;;  %v1721_v56 = vadd.f32 1.0, %v1143_v20  ;;  %1154 = vrcp.f32 %v1716_v36  ;;  %v738_v19 = vand.u32 2147483647, %v1708_v13  ;;  %v726_v37 = vor.u32 1.1754944e-38, %v725_v16 }
 0x20b   : > { %v1726_v51 = vadd.f32 1.0, %v1145_v46  ;;  %1156 = vrcp.f32 %v1719_v24  ;;  %vm734_vm9 = vweird.f32 %v1708_v13  ;;  %vm1797_vm10 = vcmp.eq.f32.partialorder %v708_v63, 8.507059e+37 }
 0x20c   : > { %v1712_v58 = vpop.eup %1146  ;;  %1158 = vrcp.f32 %v1721_v56  ;;  %vm1801_vm11 = vcmp.eq.f32.partialorder %v723_v39, 8.507059e+37  ;;  %v741_v6 = vor.u32 1.1754944e-38, %v740_v28  ;;  %vm749_vm13 = vweird.f32 %v1710_v47 }
 0x20d   : > { %v1714_v23 = vpop.eup %1148  ;;  %v700_v53 = vmul.f32 %v1712_v58, %v1702_v33  ;;  %1160 = vrcp.f32 %v1726_v51  ;;  %vm705_vm4 = vweird.f32 %v1712_v58  ;;  %v753_v17 = vand.u32 2147483647, %v1710_v47 }
 0x20e   : > { %v715_v55 = vmul.f32 %v1714_v23, %v1704_v14  ;;  %v1732_v61 = vpop.eup %1150  ;;  %vm720_vm6 = vweird.f32 %v1714_v23  ;;  %vm1764_vm7 = vmor %vm704_vm3, %vm705_vm4  ;;  %vm1810_vm15 = vcmp.eq.f32.partialorder %v738_v19, 8.507059e+37  ;;  %v755_v43 = vand.u32 2147483648, %v1710_v47 }
 0x20f   : > { %v701_v12 = vsub.f32 1.0, %v700_v53  ;;  %v1736_v45 = vpop.eup %1152  ;;  %v730_v3 = vmul.f32 %v1732_v61, %v1708_v13  ;;  %vm1774_vm8 = vmor %vm719_vm5, %vm720_vm6  ;;  %vm735_vm12 = vweird.f32 %v1732_v61  ;;  %vm764_vm0 = vweird.f32 %v1716_v36 }
 0x210   : > { %v716_v21 = vsub.f32 1.0, %v715_v55  ;;  %v1740_v50 = vpop.eup %1154  ;;  %v745_v22 = vmul.f32 %v1736_v45, %v1710_v47  ;;  %vm750_vm14 = vweird.f32 %v1736_v45  ;;  %vm1826_vm2 = vmor %vm734_vm9, %vm735_vm12  ;;  %vm779_vm3 = vweird.f32 %v1719_v24 }
 0x211   : > { %v702_v62 = vmul.f32 %v1712_v58, %v701_v12  ;;  %v1743_v10 = vpop.eup %1156  ;;  %v731_v30 = vsub.f32 1.0, %v730_v3  ;;  %v760_v2 = vmul.f32 %v1740_v50, %v1716_v36  ;;  %vm765_vm1 = vweird.f32 %v1740_v50  ;;  %vm1838_vm5 = vmor %vm749_vm13, %vm750_vm14 }
 0x212   : > { %v717_v38 = vmul.f32 %v1714_v23, %v716_v21  ;;  %v1748_v0 = vpop.eup %1158  ;;  %v775_v4 = vmul.f32 %v1743_v10, %v1719_v24  ;;  %v746_v31 = vsub.f32 1.0, %v745_v22  ;;  %vm780_vm4 = vweird.f32 %v1743_v10  ;;  %v2147_v21 = vld [vmem:[#allocation10_spill] sm:$0xff] }
 0x213   : > { %v1752_v1 = vpop.eup %1160  ;;  %v1758_v44 = vadd.f32 %v1712_v58, %v702_v62  ;;  %v790_v7 = vmul.f32 %v1748_v0, %v1721_v56  ;;  %v732_v15 = vmul.f32 %v1732_v61, %v731_v30  ;;  %v761_v8 = vsub.f32 1.0, %v760_v2  ;;  %vm1867_vm14 = vmor %vm779_vm3, %vm780_vm4 }
 0x214   : > { %v1769_v59 = vadd.f32 %v1714_v23, %v717_v38  ;;  %v805_v9 = vmul.f32 %v1752_v1, %v1726_v51  ;;  %v776_v29 = vsub.f32 1.0, %v775_v4  ;;  %v747_v52 = vmul.f32 %v1736_v45, %v746_v31 }
 0x215   : > { %v707_v41 = vsel %vm1764_vm7, %v1712_v58, %v1758_v44  ;;  %v791_v18 = vsub.f32 1.0, %v790_v7  ;;  %v733_v14 = vadd.f32 %v1732_v61, %v732_v15  ;;  %v762_v60 = vmul.f32 %v1740_v50, %v761_v8 }
 0x216   : > { %v722_v32 = vsel %vm1774_vm8, %v1714_v23, %v1769_v59  ;;  %v806_v33 = vsub.f32 1.0, %v805_v9  ;;  %v777_v20 = vmul.f32 %v1743_v10, %v776_v29  ;;  %v748_v46 = vadd.f32 %v1736_v45, %v747_v52  ;;  %vm1849_vm8 = vmor %vm764_vm0, %vm765_vm1 }
 0x217   : > { %v768_v58 = vand.u32 2147483647, %v1716_v36  ;;  %v770_v23 = vand.u32 2147483648, %v1716_v36  ;;  %v792_v55 = vmul.f32 %v1748_v0, %v791_v18  ;;  %v783_v13 = vand.u32 2147483647, %v1719_v24 }
 0x218   : > { %v807_v12 = vmul.f32 %v1752_v1, %v806_v33  ;;  %v785_v3 = vand.u32 2147483648, %v1719_v24  ;;  %vm794_vm6 = vweird.f32 %v1721_v56  ;;  %vm795_vm7 = vweird.f32 %v1748_v0 }
 0x219   : > { %v763_v62 = vadd.f32 %v1740_v50, %v762_v60  ;;  %v778_v47 = vadd.f32 %v1743_v10, %v777_v20  ;;  %vm809_vm9 = vweird.f32 %v1726_v51  ;;  %vm810_vm12 = vweird.f32 %v1752_v1  ;;  %vm1874_vm0 = vmor %vm794_vm6, %vm795_vm7 }
 0x21a   : > { %v737_v22 = vsel %vm1826_vm2, %v1732_v61, %v733_v14  ;;  %vm1859_vm13 = vcmp.eq.f32.partialorder %v753_v17, 8.507059e+37  ;;  %v800_v30 = vand.u32 2147483648, %v1721_v56  ;;  %v815_v44 = vand.u32 2147483648, %v1726_v51  ;;  %vm1888_vm1 = vmor %vm809_vm9, %vm810_vm12 }
 0x21b   : > { %v793_v2 = vadd.f32 %v1748_v0, %v792_v55  ;;  %v798_v4 = vand.u32 2147483647, %v1721_v56  ;;  %v808_v11 = vadd.f32 %v1752_v1, %v807_v12  ;;  %v813_v24 = vand.u32 2147483647, %v1726_v51  ;;  %v2146_v55 = vld [vmem:[#allocation9_spill] sm:$0xff] }
 0x21c   : > { %v752_v59 = vsel %vm1838_vm5, %v1736_v45, %v748_v46  ;;  %v756_v16 = vor.u32 1.1754944e-38, %v755_v43  ;;  %v771_v28 = vor.u32 1.1754944e-38, %v770_v23  ;;  %v786_v31 = vor.u32 1.1754944e-38, %v785_v3  ;;  %v2145_v43 = vld [vmem:[#allocation23_spill] sm:$0xff] }
 0x21d   : > { %v767_v56 = vsel %vm1849_vm8, %v1740_v50, %v763_v62  ;;  %vm769_vm2 = vcmp.eq.f32.partialorder %v768_v58, 8.507059e+37  ;;  %v782_v45 = vsel %vm1867_vm14, %v1743_v10, %v778_v47  ;;  %vm784_vm3 = vcmp.eq.f32.partialorder %v783_v13, 8.507059e+37  ;;  %v2148_v3 = vld [vmem:[#allocation11_spill] sm:$0xff]  ;;  %v2149_v47 = vld [vmem:[#allocation12_spill] sm:$0xff] }
 0x21e   : > { %v1901_v48 = vsel %vm1797_vm10, %v1783_v40, %v707_v41  ;;  %v1905_v51 = vsel %vm1801_vm11, %v726_v37, %v722_v32  ;;  %v801_v39 = vor.u32 1.1754944e-38, %v800_v30  ;;  %v816_v7 = vor.u32 1.1754944e-38, %v815_v44  ;;  %v2151_v30 = vld [vmem:[#allocation15_spill] sm:$0xff] }
 0x21f   : > { %v797_v50 = vsel %vm1874_vm0, %v1748_v0, %v793_v2  ;;  %vm799_vm4 = vcmp.eq.f32.partialorder %v798_v4, 8.507059e+37  ;;  %v812_v10 = vsel %vm1888_vm1, %v1752_v1, %v808_v11  ;;  %vm814_vm5 = vcmp.eq.f32.partialorder %v813_v24, 8.507059e+37  ;;  %v2152_v2 = vld [vmem:[#allocation17_spill] sm:$0xff]  ;;  %v2153_v11 = vld [vmem:[#allocation19_spill] sm:$0xff] }
 0x220   : > { %v1915_v40 = vsel %vm1810_vm15, %v741_v6, %v737_v22  ;;  %v1919_v15 = vsel %vm1859_vm13, %v756_v16, %v752_v59  ;;  %v1921_v41 = vsel %vm769_vm2, %v771_v28, %v767_v56  ;;  %v1923_v19 = vsel %vm784_vm3, %v786_v31, %v782_v45 }
 0x221   : > { %v1929_v32 = vsel %vm799_vm4, %v801_v39, %v797_v50  ;;  %v1931_v37 = vsel %vm814_vm5, %v816_v7, %v812_v10  ;;  %v1162_v39 = vld [vmem:[%s1411_s17 + $0x80] sm:$0xff]  ;;  %v1163_v50 = vld [vmem:[%s1411_s17 + $0x88] sm:$0xff] }
 0x239   : > { %v822_v9 = vpop.permute.xlu2 %821 }
 0x23a   : > { %v839_v0 = vadd.f32 %v822_v9, %v1901_v48  ;;  %v840_v8 = vadd.f32 %v822_v9, %v1905_v51  ;;  %v841_v1 = vadd.f32 %v822_v9, %v1915_v40  ;;  %v842_v29 = vadd.f32 %v822_v9, %v1919_v15 }
 0x23b   : > { %v843_v52 = vadd.f32 %v822_v9, %v1921_v41  ;;  %v844_v54 = vadd.f32 %v822_v9, %v1923_v19  ;;  %v845_v57 = vadd.f32 %v822_v9, %v1929_v32  ;;  %v846_v14 = vadd.f32 %v822_v9, %v1931_v37  ;;  %v1164_v9 = vld [vmem:[%s1411_s17 + $0x90] sm:$0xff] }
 0x23c   : > { %v871_v6 = vmul.f32 %v839_v0, %v1478_v25  ;;  %v872_v18 = vmul.f32 %v840_v8, %v1481_v26  ;;  %v873_v33 = vmul.f32 %v841_v1, %v1484_v27  ;;  %v874_v17 = vmul.f32 %v842_v29, %v1501_v35  ;;  %v2144_v26 = vld [vmem:[#allocation22_spill] sm:$0xff] }
 0x23d   : > { %v875_v34 = vmul.f32 %v843_v52, %v1514_v42  ;;  %v876_v25 = vmul.f32 %v844_v54, %v1527_v49  ;;  %v877_v27 = vmul.f32 %v845_v57, %v2144_v26  ;;  %v878_v42 = vmul.f32 %v846_v14, %v2145_v43  ;;  %v2154_v1 = vld [vmem:[#allocation14_spill] sm:$0xff]  ;;  %v2155_v52 = vld [vmem:[#allocation16_spill] sm:$0xff] }
 0x23e   : > { %903 = vst [vmem:[%s1944_s18] sm:$0xff] %v871_v6  ;;  %v2156_v57 = vld [vmem:[#allocation18_spill] sm:$0xff] }
 0x23f   : > { %904 = vst [vmem:[%s1944_s18 + $0x8] sm:$0xff] %v872_v18  ;;  %v2157_v18 = vld [vmem:[#allocation20_spill] sm:$0xff] }
 0x240   : > { %905 = vst [vmem:[%s1944_s18 + $0x10] sm:$0xff] %v873_v33 }
 0x241   : > { %v827_v35 = vpop.permute.xlu2 %826  ;;  %906 = vst [vmem:[%s1944_s18 + $0x18] sm:$0xff] %v874_v17  ;;  %v2158_v17 = vld [vmem:[#allocation21_spill] sm:$0xff] }
 0x242   : > { %v847_v60 = vadd.f32 %v827_v35, %v1901_v48  ;;  %v848_v20 = vadd.f32 %v827_v35, %v1905_v51  ;;  %v849_v46 = vadd.f32 %v827_v35, %v1915_v40  ;;  %v850_v58 = vadd.f32 %v827_v35, %v1919_v15  ;;  %907 = vst [vmem:[%s1944_s18 + $0x20] sm:$0xff] %v875_v34 }
 0x243   : > { %v851_v49 = vadd.f32 %v827_v35, %v1921_v41  ;;  %v852_v23 = vadd.f32 %v827_v35, %v1923_v19  ;;  %908 = vst [vmem:[%s1944_s18 + $0x28] sm:$0xff] %v876_v25  ;;  %v853_v53 = vadd.f32 %v827_v35, %v1929_v32  ;;  %v854_v38 = vadd.f32 %v827_v35, %v1931_v37 }
 0x244   : > { %v879_v12 = vmul.f32 %v847_v60, %v2146_v55  ;;  %v880_v13 = vmul.f32 %v848_v20, %v2147_v21  ;;  %v881_v62 = vmul.f32 %v849_v46, %v2148_v3  ;;  %909 = vst [vmem:[%s1944_s18 + $0x30] sm:$0xff] %v877_v27  ;;  %v882_v22 = vmul.f32 %v850_v58, %v2149_v47  ;;  %v1167_v46 = vld [vmem:[%s1411_s17 + $0xd0] sm:$0xff]  ;;  %v1169_v58 = vld [vmem:[%s1411_s17 + $0xe0] sm:$0xff] }
 0x245   : > { %910 = vst [vmem:[%s1944_s18 + $0x38] sm:$0xff] %v878_v42  ;;  %v883_v36 = vmul.f32 %v851_v49, %v2150_v5  ;;  %v884_v44 = vmul.f32 %v852_v23, %v2151_v30  ;;  %v885_v61 = vmul.f32 %v853_v53, %v2152_v2  ;;  %v886_v24 = vmul.f32 %v854_v38, %v2153_v11  ;;  %v1170_v23 = vld [vmem:[%s1411_s17 + $0xe8] sm:$0xff]  ;;  %v1171_v55 = vld [vmem:[%s1411_s17 + $0xf0] sm:$0xff] }
 0x246   : > { %911 = vst [vmem:[%s1944_s18 + $0x40] sm:$0xff] %v879_v12 }
 0x247   : > { %912 = vst [vmem:[%s1944_s18 + $0x48] sm:$0xff] %v880_v13 }
 0x248   : > { %913 = vst [vmem:[%s1944_s18 + $0x50] sm:$0xff] %v881_v62 }
 0x249   : > { %v832_v4 = vpop.permute.xlu2 %831  ;;  %914 = vst [vmem:[%s1944_s18 + $0x58] sm:$0xff] %v882_v22 }
 0x24a   : > { %v855_v59 = vadd.f32 %v832_v4, %v1901_v48  ;;  %v856_v16 = vadd.f32 %v832_v4, %v1905_v51  ;;  %v857_v28 = vadd.f32 %v832_v4, %v1915_v40  ;;  %v858_v31 = vadd.f32 %v832_v4, %v1919_v15  ;;  %915 = vst [vmem:[%s1944_s18 + $0x60] sm:$0xff] %v883_v36 }
 0x24b   : > { %v859_v63 = vadd.f32 %v832_v4, %v1921_v41  ;;  %v860_v56 = vadd.f32 %v832_v4, %v1923_v19  ;;  %916 = vst [vmem:[%s1944_s18 + $0x68] sm:$0xff] %v884_v44  ;;  %v861_v45 = vadd.f32 %v832_v4, %v1929_v32  ;;  %v862_v8 = vadd.f32 %v832_v4, %v1931_v37 }
 0x24c   : > { %v887_v7 = vmul.f32 %v1162_v39, %v855_v59  ;;  %v888_v10 = vmul.f32 %v1163_v50, %v856_v16  ;;  %v889_v0 = vmul.f32 %v1164_v9, %v857_v28  ;;  %917 = vst [vmem:[%s1944_s18 + $0x70] sm:$0xff] %v885_v61  ;;  %v890_v29 = vmul.f32 %v858_v31, %v2154_v1 }
 0x24d   : > { %918 = vst [vmem:[%s1944_s18 + $0x78] sm:$0xff] %v886_v24  ;;  %v891_v54 = vmul.f32 %v859_v63, %v2155_v52  ;;  %v892_v6 = vmul.f32 %v860_v56, %v2156_v57  ;;  %v893_v33 = vmul.f32 %v861_v45, %v2157_v18  ;;  %v894_v34 = vmul.f32 %v862_v8, %v2158_v17 }
 0x24e   : > { %919 = vst [vmem:[%s1944_s18 + $0x80] sm:$0xff] %v887_v7 }
 0x24f   : > { %920 = vst [vmem:[%s1944_s18 + $0x88] sm:$0xff] %v888_v10 }
 0x250   : > { %921 = vst [vmem:[%s1944_s18 + $0x90] sm:$0xff] %v889_v0 }
 0x251   : > { %v837_v14 = vpop.permute.xlu2 %836  ;;  %922 = vst [vmem:[%s1944_s18 + $0x98] sm:$0xff] %v890_v29 }
 0x252   : > { %v863_v25 = vadd.f32 %v837_v14, %v1901_v48  ;;  %v864_v26 = vadd.f32 %v837_v14, %v1905_v51  ;;  %v865_v27 = vadd.f32 %v837_v14, %v1915_v40  ;;  %v866_v35 = vadd.f32 %v837_v14, %v1919_v15  ;;  %923 = vst [vmem:[%s1944_s18 + $0xa0] sm:$0xff] %v891_v54  ;;  %v1165_v48 = vld [vmem:[%s1411_s17 + $0xc0] sm:$0xff]  ;;  %v1166_v51 = vld [vmem:[%s1411_s17 + $0xc8] sm:$0xff] }
 0x253   : > { %v867_v43 = vadd.f32 %v837_v14, %v1921_v41  ;;  %v868_v42 = vadd.f32 %v837_v14, %v1923_v19  ;;  %924 = vst [vmem:[%s1944_s18 + $0xa8] sm:$0xff] %v892_v6  ;;  %v869_v60 = vadd.f32 %v837_v14, %v1929_v32  ;;  %v870_v41 = vadd.f32 %v837_v14, %v1931_v37  ;;  %v1168_v19 = vld [vmem:[%s1411_s17 + $0xd8] sm:$0xff] }
 0x254   : > { %v895_v20 = vmul.f32 %v1165_v48, %v863_v25  ;;  %v896_v40 = vmul.f32 %v1166_v51, %v864_v26  ;;  %v897_v15 = vmul.f32 %v1167_v46, %v865_v27  ;;  %925 = vst [vmem:[%s1944_s18 + $0xb0] sm:$0xff] %v893_v33  ;;  %v898_v32 = vmul.f32 %v1168_v19, %v866_v35  ;;  %v1172_v37 = vld [vmem:[%s1411_s17 + $0xf8] sm:$0xff]  ;;  %s1223_s17 = scalar_lea.hbm %s2070_s7, 512 }
 0x255   : > { %926 = vst [vmem:[%s1944_s18 + $0xb8] sm:$0xff] %v894_v34  ;;  %v899_v49 = vmul.f32 %v1169_v58, %v867_v43  ;;  %v900_v53 = vmul.f32 %v1170_v23, %v868_v42  ;;  %v901_v12 = vmul.f32 %v1171_v55, %v869_v60  ;;  %v902_v21 = vmul.f32 %v1172_v37, %v870_v41  ;;  %p1225_p1 = scmp.lt.s32.totalorder %s1223_s17, %s1219_s13 }
 0x256   : > { %927 = vst [vmem:[%s1944_s18 + $0xc0] sm:$0xff] %v895_v20 }
 0x257   : > { %928 = vst [vmem:[%s1944_s18 + $0xc8] sm:$0xff] %v896_v40  ;;  %p1226_p3 = por %p1225_p1, %p1224_p0 }
 0x258   : > { %929 = vst [vmem:[%s1944_s18 + $0xd0] sm:$0xff] %v897_v15 }
 0x259   : > { %930 = vst [vmem:[%s1944_s18 + $0xd8] sm:$0xff] %v898_v32  ;;  %p1227_p4 = pnand %p1226_p3, %p1222_p13 }
 0x25a   : > { %931 = vst [vmem:[%s1944_s18 + $0xe0] sm:$0xff] %v899_v49 }
 0x25b   : > { %932 = vst [vmem:[%s1944_s18 + $0xe8] sm:$0xff] %v900_v53 }
 0x25c   : > { %933 = vst [vmem:[%s1944_s18 + $0xf0] sm:$0xff] %v901_v12 }
 0x25d   : > { %934 = vst [vmem:[%s1944_s18 + $0xf8] sm:$0xff] %v902_v21 }
 0x25e   : > { %1230 = shalt.err (!%p1227_p4)
}
 0x25f   : > { %s1274_s23 = smov 1024   ;;  %s1275_s18 = smov 64  }
 0x260   : > { %1062 = dma.vmem_to_hbm [thread:$0]  (%p1369_p11), %s949_s20, 4096, %s951_s16, %s936_s21, %s1274_s23, %s1274_s23, %s1275_s18  }
 0x261 PF: > { %s965_s9 = sand.u32 1, %s1257_s26   ;;  %p2159_p7 = scmp.ge.s32.totalorder %s1269_s29, 2 }
 0x262   : > { %s966_s6 = scalar_lea.sflag [#allocation5], %s965_s9 }
 0x263   : > { %p1069_p5 = pnand %p2159_p7, %p1373_p12 }
 0x265   : > { %p1070_p8 = pneg %p1069_p5 }
 0x267   : > { %1252 = dma.done.wait (%p1070_p8), %s966_s6, 4096  }
 0x268   : > { %1254 = vsyncadd (%p1070_p8), %s966_s6, 4294963200  ;;  %p21_p10 = scmp.ge.s32.totalorder %s1344_s8, 4   ;;  %s2160_s26 = smov %s1261_s27 }
 0x269   : > { %s2161_s27 = smov %s1265_s28  ;;  %s2162_s28 = smov %s1356_s11 }
 0x26a   : > { %s2163_s29 = smov %s1344_s8  ;;  %23 = sbr.rel (!%p21_p10) target bundleno = 7 (0x7), region = 93 }
 0x26f   :  { %972 = vsyncpa [#allocation4], 1 }
 0x270   :  { %974 = vsyncpa [#allocation4 + $0x1], 1 }
 0x271   :  { %975 = vsyncpa [#allocation5], 1 }
 0x272   :  { %977 = vsyncpa [#allocation5 + $0x1], 1 }

</bundles_post_ra>
